<compile_context>
chip_gen: v6e
topology: v6e:2x2x1
jax: 0.10.0
libtpu: 0.0.40
codegen_flags: <defaults>
</compile_context>

<pallas_src>
import functools

import jax
import jax.numpy as jnp
from jax.experimental import pallas as pl
from jax.experimental.pallas import tpu as pltpu


def _round_up(x, m):
    return (x + m - 1) // m * m


def _vmem_capacity_bytes():
    """Generation-aware VMEM capacity (falls back to the v7x per-core 64 MiB)."""
    try:
        cap = int(pltpu.get_tpu_info().vmem_capacity_bytes)
        if cap > 0:
            return cap
    except Exception:
        pass
    return 64 * 1024 * 1024


# ---------------------------------------------------------------------------
# Pass 1 kernels: gram / colsum accumulation.
# ---------------------------------------------------------------------------
def _gram_kernel(x_ref, gram_ref, colsum_ref):
    """Full-width gram accumulation: gram += x^T x, colsum += sum(x, axis=0)."""
    i = pl.program_id(0)

    @pl.when(i == 0)
    def _init():
        gram_ref[...] = jnp.zeros_like(gram_ref)
        colsum_ref[...] = jnp.zeros_like(colsum_ref)

    x = x_ref[...]
    # Contract over rows (dim 0) directly -> the MXU sees x as-is, no XLU
    # transpose / transposed VMEM copy.
    gram_ref[...] += jax.lax.dot_general(
        x, x, dimension_numbers=(((0,), (0,)), ((), ())),
        preferred_element_type=jnp.float32)
    # dtype=f32 on the reduction avoids materializing an explicit f32 copy of x.
    colsum_ref[...] += jnp.sum(x, axis=0, dtype=jnp.float32, keepdims=True)


def _gram_panel_kernel(xr_ref, xc_ref, gram_ref, colsum_ref):
    """Column-panel gram accumulation for large D: gram[:, panel] += x^T x[:, panel].

    Grid is (column_panels, row_tiles) with semantics ("parallel", "arbitrary"),
    so the panel axis shards across TensorCores on v7x.
    """
    i = pl.program_id(1)

    @pl.when(i == 0)
    def _init():
        gram_ref[...] = jnp.zeros_like(gram_ref)
        colsum_ref[...] = jnp.zeros_like(colsum_ref)

    xr = xr_ref[...]
    xc = xc_ref[...]
    gram_ref[...] += jax.lax.dot_general(
        xr, xc, dimension_numbers=(((0,), (0,)), ((), ())),
        preferred_element_type=jnp.float32)
    colsum_ref[...] += jnp.sum(xc, axis=0, dtype=jnp.float32, keepdims=True)


# ---------------------------------------------------------------------------
# Pass 2 kernel: out = x * dvec + x @ B' + shift   (one MXU matmul, VPU filler)
# ---------------------------------------------------------------------------
def _apply_kernel(x_ref, b_ref, dvec_ref, shift_ref, out_ref):
    x = x_ref[...]
    acc = jnp.dot(x, b_ref[...], preferred_element_type=jnp.float32)
    acc = acc + x.astype(jnp.float32) * dvec_ref[...] + shift_ref[...]
    out_ref[...] = acc.astype(out_ref.dtype)


# ---------------------------------------------------------------------------
# Once-per-call finalize in plain XLA (off the hot path; never spikes VMEM).
# ---------------------------------------------------------------------------
def _finalize_stats(gram, colsum, gamma, beta, *, scale, mult, inv_temp, eps,
                    n_rows):
    w = jax.nn.softmax(gram * inv_temp, axis=1)                 # (D, D)
    mu = colsum * (1.0 / n_rows)                                # (1, D) colmean(x)
    # mean(y) = colmean(x) @ A, with A = mult*I - scale*W (never materialized).
    mean = mult * mu - scale * (mu @ w)                         # (1, D)
    # Centered gram keeps the quadratic form better conditioned than the raw
    # one-pass E[y^2] - mean^2 formula.
    gc = gram - n_rows * (mu.T @ mu)                            # (D, D)
    gca = mult * gc - scale * (gc @ w)                          # Gc @ A
    diag_q = mult * jnp.diagonal(gca) - scale * jnp.sum(w * gca, axis=0)
    var = jnp.maximum(diag_q * (1.0 / n_rows), 0.0)             # biased var(y)
    # TODO(synk): for pathologically large |mean|/std the analytic variance can
    # still lose precision relative to a literal second pass over y.
    inv_std = jax.lax.rsqrt(var + eps)
    sc = gamma.astype(jnp.float32) * inv_std                    # gamma / std, (D,)
    shift = (beta.astype(jnp.float32) - mean[0] * sc).reshape(1, -1)
    dvec = (mult * sc).reshape(1, -1)
    b = (-scale) * (w * sc[None, :])                            # (D, D)
    return b, dvec, shift


# ---------------------------------------------------------------------------
# Tiling / VMEM planning (generation-aware).
# ---------------------------------------------------------------------------
def _plan(N, D, itemsize, b_itemsize):
    cap = _vmem_capacity_bytes()
    budget = int(cap * 0.65)                  # tile-sizing budget
    vmem_hi = cap - (8 << 20)                 # vmem_limit_bytes ceiling
    sub = max(8, 32 // itemsize)              # sublane multiple for the dtype

    # Pass-1 full-width path residency: gram output (single-buffered) plus a
    # conservative allowance for the (D,D) dot result, plus colsum.
    res1_full = 2 * D * D * 4 + 2 * D * 4
    use_panels = res1_full > int(0.7 * budget)

    nj, dc = 1, D
    if use_panels:
        found = False
        if D % 128 == 0:
            for cand_nj in range(2, D // 128 + 1):
                if D % cand_nj:
                    continue
                cand_dc = D // cand_nj
                if cand_dc % 128:
                    continue
                res1_c = 2 * D * cand_dc * 4 + 2 * cand_dc * 4
                per_row1_c = 2 * D * itemsize + 2 * cand_dc * itemsize
                if (res1_c <= int(0.7 * budget)
                        and (budget - res1_c) // per_row1_c >= 256):
                    nj, dc, found = cand_nj, cand_dc, True
                    break
        use_panels = found                    # no clean split -> fall back

    if use_panels:
        res1 = 2 * D * dc * 4 + 2 * dc * 4
        per_row1 = 2 * D * itemsize + 2 * dc * itemsize
    else:
        res1 = res1_full
        per_row1 = 2 * D * itemsize

    # Pass-2 residency: B' + dvec + shift (single-buffered, constant index);
    # per-row: double-buffered in/out tiles plus the f32 accumulator.
    res2 = D * D * b_itemsize + 2 * D * 4
    per_row2 = 4 * D * itemsize + D * 4
    # TODO(synk): when D*D*b_itemsize alone approaches VMEM (e.g. D >= ~3500
    # f32 on v7x) pass 2's mixing matrix must itself be K-tiled over columns.

    avail1 = max(budget - res1, 0)
    avail2 = max(budget - res2, 0)
    tn = min(avail1 // max(per_row1, 1), avail2 // max(per_row2, 1), 2048)
    tn = max(sub, (tn // sub) * sub)          # never collapse below a sublane group
    tn = min(tn, _round_up(N, sub))

    vmem1 = int(min(max(res1 + per_row1 * tn + (2 << 20), 16 << 20), vmem_hi))
    vmem2 = int(min(max(res2 + per_row2 * tn + (2 << 20), 16 << 20), vmem_hi))
    return tn, nj, dc, use_panels, vmem1, vmem2


# ---------------------------------------------------------------------------
# Public entry point.
# ---------------------------------------------------------------------------
def contranorm(feats, gamma, beta, *, scale=0.0, temp=1.0, use_scale=False,
               eps=1e-5):
    """ContraNorm forward.  feats: (N, D); gamma, beta: (D,) BN affine."""
    N, D = feats.shape
    dtype = feats.dtype
    itemsize = jnp.dtype(dtype).itemsize
    mult = 1.0 + float(int(use_scale)) * float(scale)

    b_dtype = jnp.bfloat16 if dtype == jnp.bfloat16 else jnp.float32
    b_itemsize = jnp.dtype(b_dtype).itemsize

    tn, nj, dc, use_panels, vmem1, vmem2 = _plan(N, D, itemsize, b_itemsize)

    n_pad = _round_up(N, tn)
    n_tiles = n_pad // tn
    # Zero rows contribute nothing to gram/colsum; padded output rows are
    # sliced off at the end.
    x = feats if n_pad == N else jnp.pad(feats, ((0, n_pad - N), (0, 0)))

    # ------------------------------ pass 1 ----------------------------------
    out_shapes = (jax.ShapeDtypeStruct((D, D), jnp.float32),
                  jax.ShapeDtypeStruct((1, D), jnp.float32))
    cost1 = pl.CostEstimate(
        flops=int(2 * n_pad * D * D), transcendentals=0,
        bytes_accessed=int((nj if use_panels else 1) * n_pad * D * itemsize
                           + D * D * 4 + 2 * D * 4))

    if use_panels:
        gram, colsum = pl.pallas_call(
            _gram_panel_kernel,
            out_shape=out_shapes,
            grid=(nj, n_tiles),
            in_specs=[
                pl.BlockSpec((tn, D), lambda j, i: (i, 0)),
                pl.BlockSpec((tn, dc), lambda j, i: (i, j)),
            ],
            out_specs=(
                pl.BlockSpec((D, dc), lambda j, i: (0, j),
                             pipeline_mode=pl.Buffered(1)),
                pl.BlockSpec((1, dc), lambda j, i: (0, j),
                             pipeline_mode=pl.Buffered(1)),
            ),
            compiler_params=pltpu.CompilerParams(
                dimension_semantics=("parallel", "arbitrary"),
                vmem_limit_bytes=vmem1),
            cost_estimate=cost1,
        )(x, x)
    else:
        gram, colsum = pl.pallas_call(
            _gram_kernel,
            out_shape=out_shapes,
            grid=(n_tiles,),
            in_specs=[pl.BlockSpec((tn, D), lambda i: (i, 0))],
            out_specs=(
                pl.BlockSpec((D, D), lambda i: (0, 0),
                             pipeline_mode=pl.Buffered(1)),
                pl.BlockSpec((1, D), lambda i: (0, 0),
                             pipeline_mode=pl.Buffered(1)),
            ),
            compiler_params=pltpu.CompilerParams(
                dimension_semantics=("arbitrary",),
                vmem_limit_bytes=vmem1),
            cost_estimate=cost1,
        )(x)

    # ---------------- finalize (once per call, plain XLA) -------------------
    b_mat, dvec, shift = _finalize_stats(
        gram, colsum, gamma, beta, scale=float(scale), mult=mult,
        inv_temp=1.0 / float(temp), eps=float(eps), n_rows=float(N))
    # Feed the MXU at its native rate when the activations are bf16.
    b_mat = b_mat.astype(b_dtype)

    # ------------------------------ pass 2 ----------------------------------
    cost2 = pl.CostEstimate(
        flops=int(2 * n_pad * D * D + 3 * n_pad * D), transcendentals=0,
        bytes_accessed=int(2 * n_pad * D * itemsize + D * D * b_itemsize
                           + 2 * D * 4))

    out = pl.pallas_call(
        _apply_kernel,
        out_shape=jax.ShapeDtypeStruct((n_pad, D), dtype),
        grid=(n_tiles,),
        in_specs=[
            pl.BlockSpec((tn, D), lambda i: (i, 0)),
            pl.BlockSpec((D, D), lambda i: (0, 0),
                         pipeline_mode=pl.Buffered(1)),
            pl.BlockSpec((1, D), lambda i: (0, 0),
                         pipeline_mode=pl.Buffered(1)),
            pl.BlockSpec((1, D), lambda i: (0, 0),
                         pipeline_mode=pl.Buffered(1)),
        ],
        out_specs=pl.BlockSpec((tn, D), lambda i: (i, 0)),
        compiler_params=pltpu.CompilerParams(
            dimension_semantics=("parallel",),
            vmem_limit_bytes=vmem2),
        cost_estimate=cost2,
    )(x, b_mat, dvec, shift)

    return out[:N] if n_pad != N else out


def _contranorm_ref(feats, gamma, beta, *, scale, temp, use_scale, eps=1e-5):
    """Pure-JAX reference mirroring the PyTorch forward (training-mode BN)."""
    x = feats.astype(jnp.float32)
    w = jax.nn.softmax(x.T @ x / temp, axis=1)
    mult = 1.0 + float(int(use_scale)) * scale
    y = mult * x - scale * (x @ w)
    mean = jnp.mean(y, axis=0, keepdims=True)
    var = jnp.mean((y - mean) ** 2, axis=0, keepdims=True)
    out = (y - mean) / jnp.sqrt(var + eps) * gamma[None, :] + beta[None, :]
    return out.astype(feats.dtype)


if __name__ == "__main__":
    # Module config (nontrivial to exercise the full path).
    hidden_dim = 32
    seq = 8
    scale = 0.5
    temp = 1.0
    use_scale = True

    key = jax.random.PRNGKey(0)
    feats = jax.random.normal(key, (seq, hidden_dim), dtype=jnp.float32)

    # BatchNorm1d parameters: PyTorch default init (weight=1, bias=0).
    gamma = jnp.ones((hidden_dim,), dtype=jnp.float32)
    beta = jnp.zeros((hidden_dim,), dtype=jnp.float32)
    # TODO(synk): nn.BatchNorm1d running_mean/running_var buffer updates are a
    # training-time side effect and do not affect this forward output.

    out = contranorm(feats, gamma, beta, scale=scale, temp=temp,
                     use_scale=use_scale)
    out = jax.block_until_ready(out)

    ref = _contranorm_ref(feats, gamma, beta, scale=scale, temp=temp,
                          use_scale=use_scale)
    assert out.shape == ref.shape
    assert jnp.allclose(out, ref, atol=1e-4, rtol=1e-4), "mismatch vs reference"

    print("KERNEL_OK")
</pallas_src>

<mosaic_0001>
module attributes {stable_mosaic.version = 11 : i64} {
  func.func @_gram_kernel(%arg0: i32, %arg1: memref<8x32xf32, #tpu.memory_space<vmem>>, %arg2: memref<32x32xf32, #tpu.memory_space<vmem>>, %arg3: memref<1x32xf32, #tpu.memory_space<vmem>>) attributes {dimension_semantics = [#tpu.dimension_semantics<arbitrary>], iteration_bounds = array<i64: 1>, scalar_prefetch = 0 : i64, scratch_operands = 0 : i64, tpu.core_type = #tpu.core_type<tc>, window_params = [{transform_indices = @transform_0, window_bounds = array<i64: 8, 32>}, {pipeline_mode = #tpu.pipeline_mode<synchronous>, transform_indices = @transform_1, window_bounds = array<i64: 32, 32>}, {pipeline_mode = #tpu.pipeline_mode<synchronous>, transform_indices = @transform_2, window_bounds = array<i64: 1, 32>}]} {
    %c0_i32 = arith.constant 0 : i32
    %0 = arith.cmpi eq, %arg0, %c0_i32 : i32
    %1 = arith.extui %0 : i1 to i32
    %c0_i32_0 = arith.constant 0 : i32
    %2 = arith.cmpi ne, %1, %c0_i32_0 : i32
    scf.if %2 {
      %cst_11 = arith.constant 0.000000e+00 : f32
      %13 = vector.broadcast %cst_11 : f32 to vector<32x32xf32>
      %c0_12 = arith.constant 0 : index
      %c0_13 = arith.constant 0 : index
      %14 = vector.load %arg2[%c0_12, %c0_13] : memref<32x32xf32, #tpu.memory_space<vmem>>, vector<32x32xf32>
      tpu.vector_store %arg2[%c0_12, %c0_13], %13 {strides = array<i32>} : memref<32x32xf32, #tpu.memory_space<vmem>>, vector<32x32xf32>,
      %cst_14 = arith.constant 0.000000e+00 : f32
      %15 = vector.broadcast %cst_14 : f32 to vector<1x32xf32>
      %c0_15 = arith.constant 0 : index
      %c0_16 = arith.constant 0 : index
      %16 = vector.load %arg3[%c0_15, %c0_16] : memref<1x32xf32, #tpu.memory_space<vmem>>, vector<1x32xf32>
      tpu.vector_store %arg3[%c0_15, %c0_16], %15 {strides = array<i32>} : memref<1x32xf32, #tpu.memory_space<vmem>>, vector<1x32xf32>,
    } else {
    }
    %c0 = arith.constant 0 : index
    %c0_1 = arith.constant 0 : index
    %3 = vector.load %arg1[%c0, %c0_1] : memref<8x32xf32, #tpu.memory_space<vmem>>, vector<8x32xf32>
    %c0_2 = arith.constant 0 : index
    %c0_3 = arith.constant 0 : index
    %4 = vector.load %arg2[%c0_2, %c0_3] : memref<32x32xf32, #tpu.memory_space<vmem>>, vector<32x32xf32>
    %cst = arith.constant dense<0.000000e+00> : vector<32x32xf32>
    %5 = tpu.matmul %3, %3, %cst {dimension_numbers = #tpu.dot_dimension_numbers<[0], [0], [1], [1], [0, 1, 1, 1], [], []>} : vector<8x32xf32>, vector<8x32xf32>, vector<32x32xf32> -> vector<32x32xf32>
    %6 = arith.addf %4, %5 : vector<32x32xf32>
    %c0_4 = arith.constant 0 : index
    %c0_5 = arith.constant 0 : index
    %7 = vector.load %arg2[%c0_4, %c0_5] : memref<32x32xf32, #tpu.memory_space<vmem>>, vector<32x32xf32>
    tpu.vector_store %arg2[%c0_4, %c0_5], %6 {strides = array<i32>} : memref<32x32xf32, #tpu.memory_space<vmem>>, vector<32x32xf32>,
    %c0_6 = arith.constant 0 : index
    %c0_7 = arith.constant 0 : index
    %8 = vector.load %arg3[%c0_6, %c0_7] : memref<1x32xf32, #tpu.memory_space<vmem>>, vector<1x32xf32>
    %cst_8 = arith.constant dense<0.000000e+00> : vector<32xf32>
    %9 = vector.multi_reduction <add>, %3, %cst_8 [0] : vector<8x32xf32> to vector<32xf32>
    %10 = vector.shape_cast %9 : vector<32xf32> to vector<1x32xf32>
    %11 = arith.addf %8, %10 : vector<1x32xf32>
    %c0_9 = arith.constant 0 : index
    %c0_10 = arith.constant 0 : index
    %12 = vector.load %arg3[%c0_9, %c0_10] : memref<1x32xf32, #tpu.memory_space<vmem>>, vector<1x32xf32>
    tpu.vector_store %arg3[%c0_9, %c0_10], %11 {strides = array<i32>} : memref<1x32xf32, #tpu.memory_space<vmem>>, vector<1x32xf32>,
    return
  }
  func.func @transform_0(%arg0: i32) -> (i32, i32) {
    %c0_i32 = arith.constant 0 : i32
    %c0_i32_0 = arith.constant 0 : i32
    return %arg0, %c0_i32 : i32, i32
  }
  func.func @transform_1(%arg0: i32) -> (i32, i32) {
    %c0_i32 = arith.constant 0 : i32
    %c0_i32_0 = arith.constant 0 : i32
    %c0_i32_1 = arith.constant 0 : i32
    return %c0_i32, %c0_i32_0 : i32, i32
  }
  func.func @transform_2(%arg0: i32) -> (i32, i32) {
    %c0_i32 = arith.constant 0 : i32
    %c0_i32_0 = arith.constant 0 : i32
    %c0_i32_1 = arith.constant 0 : i32
    return %c0_i32, %c0_i32_0 : i32, i32
  }
}

</mosaic_0001>

<bundles_post_ra>
// kernel: tpu_custom_call.1
= control target key start
LH: loop header
LB: loop body
LE: loop exit
PB: predicated region body
PF: predicated region fallthrough
CT: control target
= control target key end

     0   :  { %8 = vsyncpa [#allocation3], 0  ;;  %s351_s0 = inlined_call_operand.hbm [shape: f32[8,32], index: 0, kind: input, shape index: {}]   ;;  %s352_s1 = inlined_call_operand.hbm [shape: f32[32,32], index: 1, kind: output, shape index: {0}]   ;;  %s353_s2 = inlined_call_operand.hbm [shape: f32[1,32], index: 2, kind: output, shape index: {1}]  }
   0x1   :  { %9 = vsyncpa [#allocation4], 0 }
   0x2   :  { %10 = vsyncpa [#allocation7], 0  ;;  %s312_s9 = smov [#allocation2]  }
   0x3   :  { %s17_s10 = sshll.u32 %s312_s9, 4  ;;  %s18_s10 = int_to_ptr.vmem [resolvable:$true] %s17_s10 }
   0x4   :  { %s254_s11 = scalar_lea.vmem %s18_s10, 128  ;;  %p259_p1 = scmp.lt.s32.totalorder %s18_s10, %s18_s10 }
   0x5   :  { %p255_p0 = scmp.ne.s32.totalorder %s18_s10, %s254_s11  ;;  %p260_p2 = scmp.lt.s32.totalorder %s254_s11, %s254_s11 }
   0x7   :  { %p261_p3 = por %p260_p2, %p259_p1 }
   0x9   :  { %p262_p4 = pnand %p261_p3, %p255_p0 }
   0xb   :  { %265 = shalt.err (!%p262_p4)
}
   0xc   :  { %20 = dma.hbm_to_vmem [thread:$0]  %s351_s0, 128, %s18_s10, [#allocation3]  }
   0xd   :  { %306 = dma.done.wait [#allocation3], 128  }
   0xe   :  { %307 = vsyncadd [#allocation3], 4294967168  ;;  %v35_v0 = vld [vmem:[#allocation2] sm:$0xff]  ;;  %vm28_vm0 = vcmask 261120   ;;  %v313_v1 = vmov 0.0   ;;  %vm72_vm1 = vcmask 64512  }
   0xf   :  { %40 = vxpose.xlu0.b32.start.end [1/1] (short) (narrow) %v35_v0, 32  ;;  %230 = vmatprep.subr.mxu0 %v35_v0  ;;  %30 = vst.msk [vmem:[#allocation5 + $0x8] sm:$0xff] %vm28_vm0, %v313_v1  ;;  %29 = vst.msk [vmem:[#allocation5] sm:$0xff] %vm28_vm0, %v313_v1  ;;  %v180_v6 = vsel %vm28_vm0, %v35_v0, 0.0  ;;  %vm33_vm2 = vcmask 253952   ;;  %s314_s0 = smov [#allocation6]  }
  0x10   :  { %231 = vmatpush3.msra.mxu0 %v35_v0  ;;  %238 = vmatprep.subr.mxu1 %v35_v0  ;;  %31 = vst.msk [vmem:[#allocation5 + $0x10] sm:$0xff] %vm28_vm0, %v313_v1  ;;  %32 = vst.msk [vmem:[#allocation5 + $0x18] sm:$0xff] %vm28_vm0, %v313_v1  ;;  %v181_v7 = vrot.slane %v180_v6, 4  ;;  %s208_s14 = sshll.u32 %s314_s0, 4  ;;  %s209_s14 = int_to_ptr.vmem [resolvable:$true] %s208_s14 }
  0x11   :  { %239 = vmatpush3.msra.mxu1 %v35_v0  ;;  %34 = vst.msk [vmem:[#allocation6] sm:$0x1] %vm33_vm2, %v313_v1  ;;  %s266_s15 = scalar_lea.vmem %s209_s14, 16  ;;  %s270_s16 = scalar_lea.vmem %s209_s14, 32 }
  0x12   :  { %v182_v8 = vadd.f32 %v181_v7, %v180_v6  ;;  %p267_p5 = scmp.ne.s32.totalorder %s209_s14, %s266_s15  ;;  %p271_p6 = scmp.lt.s32.totalorder %s209_s14, %s209_s14 }
  0x13   :  { %p272_p7 = scmp.lt.s32.totalorder %s270_s16, %s266_s15 }
  0x14   :  { %v183_v9 = vrot.slane %v182_v8, 2 }
  0x15   :  { %p273_p8 = por %p272_p7, %p271_p6 }
  0x16   :  { %v184_v10 = vadd.f32 %v183_v9, %v182_v8 }
  0x17   :  { %p274_p9 = pnand %p273_p8, %p267_p5 }
  0x18   :  { %v185_v11 = vrot.slane %v184_v10, 1  ;;  %v179_v13 = vld [vmem:[#allocation6] sm:$0x1] }
  0x1a   :  { %v186_v12 = vadd.f32 %v185_v11, %v184_v10 }
  0x1c   :  { %v187_v14 = vadd.f32 %v186_v12, %v179_v13 }
  0x1e   :  { %189 = vst.msk [vmem:[#allocation6] sm:$0x1] %vm33_vm2, %v187_v14 }
  0x8b   :  { %v56_v2 = vpop.trf.xlu0 }
  0x8c   :  { %232 = vmatprep.mubr.msk.f32.mxu0 %vm72_vm1, %v56_v2 }
  0x8f   :  { %v57_v3 = vpop.trf.xlu0 }
  0x90   :  { %233 = vmatmul.mubr.msk.f32.vlgmr.msra.gmra.mxu0 %vm72_vm1, %v57_v3 }
  0x93   :  { %v58_v4 = vpop.trf.xlu0 }
  0x94   :  { %235 = vmatprep.mubr.msk.f32.mxu1 %vm72_vm1, %v58_v4 }
  0x97   :  { %v59_v5 = vpop.trf.xlu0 }
  0x98   :  { %236 = vmatmul.mubr.msk.f32.vlgmr.msra.gmra.mxu1 %vm72_vm1, %v59_v5 }
  0x99   :  { %277 = shalt.err (!%p274_p9)
}
  0x9a   :  { %211 = dma.vmem_to_hbm [thread:$0]  %s209_s14, 16, %s353_s2, [#allocation7]   ;;  %v37_v15 = vld [vmem:[#allocation5 + $0x8] sm:$0xff]  ;;  %v36_v17 = vld [vmem:[#allocation5] sm:$0xff]  ;;  %v39_v21 = vld [vmem:[#allocation5 + $0x18] sm:$0xff] }
  0x9b   :  { %s315_s19 = smov [#allocation5]   ;;  %v38_v23 = vld [vmem:[#allocation5 + $0x10] sm:$0xff] }
  0x9c   :  { %s195_s20 = sshll.u32 %s315_s19, 4  ;;  %s196_s20 = int_to_ptr.vmem [resolvable:$true] %s195_s20 }
  0x9d   :  { %s286_s2 = scalar_lea.vmem %s196_s20, 512  ;;  %p291_p11 = scmp.lt.s32.totalorder %s196_s20, %s196_s20 }
  0x9e   :  { %p287_p10 = scmp.ne.s32.totalorder %s196_s20, %s286_s2  ;;  %p292_p12 = scmp.lt.s32.totalorder %s286_s2, %s286_s2 }
  0xa0   :  { %p293_p13 = por %p292_p12, %p291_p11 }
  0xa2   :  { %p294_p0 = pnand %p293_p13, %p287_p10 }
 0x150   :  { %v234_v16 = vpop.f32.mrf.mxu0 }
 0x151   :  { %v171_v18 = vadd.f32 %v234_v16, %v37_v15 }
 0x152   :  { %v151_v19 = vpop.f32.mrf.mxu0 }
 0x153   :  { %176 = vst.msk [vmem:[#allocation5 + $0x8] sm:$0xff] %vm28_vm0, %v171_v18  ;;  %v170_v20 = vadd.f32 %v151_v19, %v36_v17 }
 0x155   :  { %175 = vst.msk [vmem:[#allocation5] sm:$0xff] %vm28_vm0, %v170_v20 }
 0x158   :  { %v237_v22 = vpop.f32.mrf.mxu1 }
 0x159   :  { %v173_v24 = vadd.f32 %v237_v22, %v39_v21 }
 0x15a   :  { %v161_v25 = vpop.f32.mrf.mxu1 }
 0x15b   :  { %178 = vst.msk [vmem:[#allocation5 + $0x18] sm:$0xff] %vm28_vm0, %v173_v24  ;;  %v172_v26 = vadd.f32 %v161_v25, %v38_v23 }
 0x15d   :  { %177 = vst.msk [vmem:[#allocation5 + $0x10] sm:$0xff] %vm28_vm0, %v172_v26 }
 0x15e   :  { %297 = shalt.err (!%p294_p0)
}
 0x15f   :  { %s316_s21 = smov 128   ;;  %s317_s22 = smov 8  }
 0x160   :  { %201 = dma.vmem_to_hbm [thread:$0]  %s196_s20, 512, %s352_s1, [#allocation4], %s316_s21, %s316_s21, %s317_s22  }
 0x161   :  { %308 = dma.done.wait [#allocation4], 512  }
 0x162   :  { %309 = vsyncadd [#allocation4], 4294966784 }
 0x163   :  { %310 = dma.done.wait [#allocation7], 16  }
 0x164   :  { %311 = vsyncadd [#allocation7], 4294967280 }
 0x165   :  { %218 = vsyncpa [#allocation3], 1 }
 0x166   :  { %219 = vsyncpa [#allocation4], 1 }
 0x167   :  { %220 = vsyncpa [#allocation7], 1 }

</bundles_post_ra>
